<compile_context>
chip_gen: v5e
topology: v5e:2x2
jax: 0.10.0
libtpu: 0.0.40
codegen_flags: <defaults>
</compile_context>

<pallas_src>
import functools

import jax
import jax.numpy as jnp
from jax.experimental import pallas as pl
from jax.experimental.pallas import tpu as pltpu


def _round_up(n, m):
    return ((n + m - 1) // m) * m


def _make_mlp_argmax_kernel(num_layers, c_pad):
    """Kernel: x tile + (W, b) per layer (resident) -> (1, TILE_B) int32 predictions."""

    def kernel(x_ref, *refs):
        out_ref = refs[-1]
        wb_refs = refs[:-1]  # alternating (w_ref, b_ref) per layer

        h = x_ref[...]
        for l in range(num_layers):
            w_ref = wb_refs[2 * l]
            b_ref = wb_refs[2 * l + 1]
            # MXU matmul with f32 accumulation, f32 bias add.
            h = jnp.dot(h, w_ref[...], preferred_element_type=jnp.float32)
            h = h + b_ref[...]
            if l < num_layers - 1:
                # ReLU, then back to the compute dtype for the next MXU pass.
                h = jnp.maximum(h, 0.0).astype(w_ref.dtype)

        logits = h  # (TILE_B, c_pad) f32; padded classes carry bias -1e30.

        # argmax over classes with first-occurrence tie-break (matches torch/jnp).
        row_max = jnp.max(logits, axis=1, keepdims=True)
        col_idx = jax.lax.broadcasted_iota(jnp.int32, logits.shape, 1)
        masked_idx = jnp.where(logits == row_max, col_idx, c_pad)
        pred = jnp.min(masked_idx, axis=1).astype(jnp.int32)  # (TILE_B,)

        # Lane-dense writeback: batch on the 128-lane axis.
        out_ref[...] = pred.reshape(1, -1)

    return kernel


def mlp_classifier_forward(x, params, num_classes, *, tile_b=1024,
                           compute_dtype=jnp.bfloat16):
    """x: (B, input_dim) f32. params: list of (W_(in,out), b_(1,out)).

    Returns (B,) int32 predicted classes (argmax over logits, dim=1).
    """
    B, d_in = x.shape
    num_layers = len(params)

    # Lane-friendly batch tile: multiple of 128, capped for small batches.
    tile_b = min(_round_up(tile_b, 128), _round_up(max(B, 1), 128))
    b_pad = _round_up(B, tile_b)
    g = b_pad // tile_b

    # Pad batch (padded rows produce garbage predictions that are sliced off).
    if b_pad != B:
        x = jnp.pad(x, ((0, b_pad - B), (0, 0)))
    x = x.astype(compute_dtype)

    # Cast weights to compute dtype; keep biases f32 (added post-accumulation).
    ws = [w.astype(compute_dtype) for w, _ in params]
    bs = [b.astype(jnp.float32) for _, b in params]

    # Pad the class dimension of the last layer to a multiple of 128 so the logits
    # vreg ops are full-width; padded classes get bias -1e30 so they never win.
    c_pad = _round_up(num_classes, 128)
    if c_pad != num_classes:
        extra = c_pad - num_classes
        ws[-1] = jnp.pad(ws[-1], ((0, 0), (0, extra)))
        bs[-1] = jnp.pad(bs[-1], ((0, 0), (0, extra)), constant_values=-1e30)

    kernel = _make_mlp_argmax_kernel(num_layers, c_pad)

    in_specs = [pl.BlockSpec((tile_b, d_in), lambda i: (i, 0))]
    operands = [x]
    for w, b in zip(ws, bs):
        # Grid-invariant blocks: DMA'd once, resident in VMEM for all grid steps.
        in_specs.append(pl.BlockSpec(w.shape, lambda i: (0, 0)))
        in_specs.append(pl.BlockSpec(b.shape, lambda i: (0, 0)))
        operands.append(w)
        operands.append(b)

    flops = 2 * b_pad * sum(w.shape[0] * w.shape[1] for w in ws)
    bytes_accessed = (
        x.size * x.dtype.itemsize
        + sum(w.size * w.dtype.itemsize for w in ws)
        + sum(b.size * b.dtype.itemsize for b in bs)
        + g * tile_b * 4
    )

    pred = pl.pallas_call(
        kernel,
        out_shape=jax.ShapeDtypeStruct((g, tile_b), jnp.int32),
        grid=(g,),
        in_specs=in_specs,
        out_specs=pl.BlockSpec((1, tile_b), lambda i: (i, 0)),
        compiler_params=pltpu.CompilerParams(
            dimension_semantics=("parallel",)),
        cost_estimate=pl.CostEstimate(
            flops=flops, transcendentals=0, bytes_accessed=bytes_accessed),
    )(*operands)

    return pred.reshape(-1)[:B]


def init_params(key, input_dim, hidden_dims, num_classes):
    """Deterministic init mirroring nn.Linear shapes; weights stored as (in, out)."""
    dims = [input_dim] + list(hidden_dims) + [num_classes]
    params = []
    for i in range(len(dims) - 1):
        d_in, d_out = dims[i], dims[i + 1]
        key, kw, kb = jax.random.split(key, 3)
        bound = 1.0 / jnp.sqrt(d_in)
        w = jax.random.uniform(kw, (d_in, d_out), jnp.float32, -bound, bound)
        b = jax.random.uniform(kb, (1, d_out), jnp.float32, -bound, bound)
        params.append((w, b))
    return params


def _reference_forward(x, params, compute_dtype=jnp.bfloat16):
    """Pure-JAX reference mirroring the kernel's numerics (bf16 in, f32 accumulate)."""
    h = x.astype(compute_dtype)
    num_layers = len(params)
    for l, (w, b) in enumerate(params):
        h = jnp.dot(h, w.astype(compute_dtype),
                    preferred_element_type=jnp.float32) + b.astype(jnp.float32)
        if l < num_layers - 1:
            h = jnp.maximum(h, 0.0).astype(compute_dtype)
    return jnp.argmax(h, axis=1).astype(jnp.int32)


if __name__ == "__main__":
    B = 8
    INPUT_DIM = 32
    HIDDEN_DIMS = (64, 32)
    NUM_CLASSES = 10

    key = jax.random.PRNGKey(0)
    key, kx = jax.random.split(key)
    x = jax.random.normal(kx, (B, INPUT_DIM), jnp.float32)
    params = init_params(key, INPUT_DIM, HIDDEN_DIMS, NUM_CLASSES)

    pred = mlp_classifier_forward(x, params, NUM_CLASSES)
    pred = jax.block_until_ready(pred)

    ref = _reference_forward(x, params)
    assert pred.shape == (B,), pred.shape
    assert pred.dtype == jnp.int32, pred.dtype
    assert bool(jnp.all(pred == ref)), (pred, ref)
    assert bool(jnp.all((pred >= 0) & (pred < NUM_CLASSES))), pred

    print("KERNEL_OK")
</pallas_src>

<mosaic_0001>
module attributes {stable_mosaic.version = 11 : i64} {
  func.func @kernel(%arg0: i32, %arg1: memref<128x32xbf16, #tpu.memory_space<vmem>>, %arg2: memref<32x64xbf16, #tpu.memory_space<vmem>>, %arg3: memref<1x64xf32, #tpu.memory_space<vmem>>, %arg4: memref<64x32xbf16, #tpu.memory_space<vmem>>, %arg5: memref<1x32xf32, #tpu.memory_space<vmem>>, %arg6: memref<32x128xbf16, #tpu.memory_space<vmem>>, %arg7: memref<1x128xf32, #tpu.memory_space<vmem>>, %arg8: memref<1x128xi32, #tpu.memory_space<vmem>>) attributes {dimension_semantics = [#tpu.dimension_semantics<parallel>], iteration_bounds = array<i64: 1>, scalar_prefetch = 0 : i64, scratch_operands = 0 : i64, tpu.core_type = #tpu.core_type<tc>, window_params = [{transform_indices = @transform_0, window_bounds = array<i64: 128, 32>}, {pipeline_mode = #tpu.pipeline_mode<synchronous>, transform_indices = @transform_1, window_bounds = array<i64: 32, 64>}, {pipeline_mode = #tpu.pipeline_mode<synchronous>, transform_indices = @transform_2, window_bounds = array<i64: 1, 64>}, {pipeline_mode = #tpu.pipeline_mode<synchronous>, transform_indices = @transform_3, window_bounds = array<i64: 64, 32>}, {pipeline_mode = #tpu.pipeline_mode<synchronous>, transform_indices = @transform_4, window_bounds = array<i64: 1, 32>}, {pipeline_mode = #tpu.pipeline_mode<synchronous>, transform_indices = @transform_5, window_bounds = array<i64: 32, 128>}, {pipeline_mode = #tpu.pipeline_mode<synchronous>, transform_indices = @transform_6, window_bounds = array<i64: 1, 128>}, {transform_indices = @transform_7, window_bounds = array<i64: 1, 128>}]} {
    %c0 = arith.constant 0 : index
    %c0_0 = arith.constant 0 : index
    %0 = vector.load %arg1[%c0, %c0_0] : memref<128x32xbf16, #tpu.memory_space<vmem>>, vector<128x32xbf16>
    %c0_1 = arith.constant 0 : index
    %c0_2 = arith.constant 0 : index
    %1 = vector.load %arg2[%c0_1, %c0_2] : memref<32x64xbf16, #tpu.memory_space<vmem>>, vector<32x64xbf16>
    %cst = arith.constant dense<0.000000e+00> : vector<128x64xf32>
    %2 = tpu.matmul %0, %1, %cst {dimension_numbers = #tpu.dot_dimension_numbers<[1], [0], [0], [1], [0, 0, 1, 1], [], []>} : vector<128x32xbf16>, vector<32x64xbf16>, vector<128x64xf32> -> vector<128x64xf32>
    %c0_3 = arith.constant 0 : index
    %c0_4 = arith.constant 0 : index
    %3 = vector.load %arg3[%c0_3, %c0_4] : memref<1x64xf32, #tpu.memory_space<vmem>>, vector<1x64xf32>
    %4 = vector.broadcast %3 : vector<1x64xf32> to vector<128x64xf32>
    %5 = arith.addf %2, %4 : vector<128x64xf32>
    %cst_5 = arith.constant 0.000000e+00 : f32
    %6 = vector.broadcast %cst_5 : f32 to vector<128x64xf32>
    %7 = arith.maximumf %5, %6 : vector<128x64xf32>
    %8 = arith.truncf %7 : vector<128x64xf32> to vector<128x64xbf16>
    %c0_6 = arith.constant 0 : index
    %c0_7 = arith.constant 0 : index
    %9 = vector.load %arg4[%c0_6, %c0_7] : memref<64x32xbf16, #tpu.memory_space<vmem>>, vector<64x32xbf16>
    %cst_8 = arith.constant dense<0.000000e+00> : vector<128x32xf32>
    %10 = tpu.matmul %8, %9, %cst_8 {dimension_numbers = #tpu.dot_dimension_numbers<[1], [0], [0], [1], [0, 0, 1, 1], [], []>} : vector<128x64xbf16>, vector<64x32xbf16>, vector<128x32xf32> -> vector<128x32xf32>
    %c0_9 = arith.constant 0 : index
    %c0_10 = arith.constant 0 : index
    %11 = vector.load %arg5[%c0_9, %c0_10] : memref<1x32xf32, #tpu.memory_space<vmem>>, vector<1x32xf32>
    %12 = vector.broadcast %11 : vector<1x32xf32> to vector<128x32xf32>
    %13 = arith.addf %10, %12 : vector<128x32xf32>
    %cst_11 = arith.constant 0.000000e+00 : f32
    %14 = vector.broadcast %cst_11 : f32 to vector<128x32xf32>
    %15 = arith.maximumf %13, %14 : vector<128x32xf32>
    %16 = arith.truncf %15 : vector<128x32xf32> to vector<128x32xbf16>
    %c0_12 = arith.constant 0 : index
    %c0_13 = arith.constant 0 : index
    %17 = vector.load %arg6[%c0_12, %c0_13] : memref<32x128xbf16, #tpu.memory_space<vmem>>, vector<32x128xbf16>
    %cst_14 = arith.constant dense<0.000000e+00> : vector<128x128xf32>
    %18 = tpu.matmul %16, %17, %cst_14 {dimension_numbers = #tpu.dot_dimension_numbers<[1], [0], [0], [1], [0, 0, 1, 1], [], []>} : vector<128x32xbf16>, vector<32x128xbf16>, vector<128x128xf32> -> vector<128x128xf32>
    %c0_15 = arith.constant 0 : index
    %c0_16 = arith.constant 0 : index
    %19 = vector.load %arg7[%c0_15, %c0_16] : memref<1x128xf32, #tpu.memory_space<vmem>>, vector<1x128xf32>
    %20 = vector.broadcast %19 : vector<1x128xf32> to vector<128x128xf32>
    %21 = arith.addf %18, %20 : vector<128x128xf32>
    %cst_17 = arith.constant dense<0xFF800000> : vector<128xf32>
    %22 = vector.multi_reduction <maximumf>, %21, %cst_17 [1] : vector<128x128xf32> to vector<128xf32>
    %23 = vector.shape_cast %22 : vector<128xf32> to vector<128x1xf32>
    %24 = tpu.iota {dimensions = array<i32: 1>} : vector<128x128xi32>
    %25 = vector.broadcast %23 : vector<128x1xf32> to vector<128x128xf32>
    %26 = arith.cmpf oeq, %21, %25 : vector<128x128xf32>
    %c128_i32 = arith.constant 128 : i32
    %27 = vector.broadcast %c128_i32 : i32 to vector<128x128xi32>
    %28 = arith.select %26, %24, %27 : vector<128x128xi1>, vector<128x128xi32>
    %cst_18 = arith.constant dense<2147483647> : vector<128xi32>
    %29 = vector.multi_reduction <minsi>, %28, %cst_18 [1] : vector<128x128xi32> to vector<128xi32>
    %30 = vector.shape_cast %29 : vector<128xi32> to vector<1x128xi32>
    %c0_19 = arith.constant 0 : index
    %c0_20 = arith.constant 0 : index
    %31 = vector.load %arg8[%c0_19, %c0_20] : memref<1x128xi32, #tpu.memory_space<vmem>>, vector<1x128xi32>
    tpu.vector_store %arg8[%c0_19, %c0_20], %30 {strides = array<i32>} : memref<1x128xi32, #tpu.memory_space<vmem>>, vector<1x128xi32>,
    return
  }
  func.func @transform_0(%arg0: i32) -> (i32, i32) {
    %c0_i32 = arith.constant 0 : i32
    %c0_i32_0 = arith.constant 0 : i32
    return %arg0, %c0_i32 : i32, i32
  }
  func.func @transform_1(%arg0: i32) -> (i32, i32) {
    %c0_i32 = arith.constant 0 : i32
    %c0_i32_0 = arith.constant 0 : i32
    %c0_i32_1 = arith.constant 0 : i32
    return %c0_i32, %c0_i32_0 : i32, i32
  }
  func.func @transform_2(%arg0: i32) -> (i32, i32) {
    %c0_i32 = arith.constant 0 : i32
    %c0_i32_0 = arith.constant 0 : i32
    %c0_i32_1 = arith.constant 0 : i32
    return %c0_i32, %c0_i32_0 : i32, i32
  }
  func.func @transform_3(%arg0: i32) -> (i32, i32) {
    %c0_i32 = arith.constant 0 : i32
    %c0_i32_0 = arith.constant 0 : i32
    %c0_i32_1 = arith.constant 0 : i32
    return %c0_i32, %c0_i32_0 : i32, i32
  }
  func.func @transform_4(%arg0: i32) -> (i32, i32) {
    %c0_i32 = arith.constant 0 : i32
    %c0_i32_0 = arith.constant 0 : i32
    %c0_i32_1 = arith.constant 0 : i32
    return %c0_i32, %c0_i32_0 : i32, i32
  }
  func.func @transform_5(%arg0: i32) -> (i32, i32) {
    %c0_i32 = arith.constant 0 : i32
    %c0_i32_0 = arith.constant 0 : i32
    %c0_i32_1 = arith.constant 0 : i32
    return %c0_i32, %c0_i32_0 : i32, i32
  }
  func.func @transform_6(%arg0: i32) -> (i32, i32) {
    %c0_i32 = arith.constant 0 : i32
    %c0_i32_0 = arith.constant 0 : i32
    %c0_i32_1 = arith.constant 0 : i32
    return %c0_i32, %c0_i32_0 : i32, i32
  }
  func.func @transform_7(%arg0: i32) -> (i32, i32) {
    %c0_i32 = arith.constant 0 : i32
    %c0_i32_0 = arith.constant 0 : i32
    return %arg0, %c0_i32 : i32, i32
  }
}

</mosaic_0001>

<bundles_post_ra>
// kernel: tpu_custom_call.1
= control target key start
LH: loop header
LB: loop body
LE: loop exit
PB: predicated region body
PF: predicated region fallthrough
CT: control target
= control target key end

     0   :  { %s1356_s0 = inlined_call_operand.vmem [shape: bf16[128,32], index: 0, kind: input, shape index: {}]   ;;  %s1357_s1 = inlined_call_operand.vmem [shape: bf16[32,64], index: 1, kind: input, shape index: {}]   ;;  %s1358_s2 = inlined_call_operand.vmem [shape: f32[1,64], index: 2, kind: input, shape index: {}]   ;;  %s1359_s3 = inlined_call_operand.vmem [shape: bf16[64,32], index: 3, kind: input, shape index: {}]   ;;  %s1360_s4 = inlined_call_operand.vmem [shape: f32[1,32], index: 4, kind: input, shape index: {}]   ;;  %s1361_s5 = inlined_call_operand.vmem [shape: bf16[32,128], index: 5, kind: input, shape index: {}]   ;;  %s1362_s6 = inlined_call_operand.vmem [shape: f32[1,128], index: 6, kind: input, shape index: {}]   ;;  %s1363_s7 = inlined_call_operand.hbm [shape: s32[1,128], index: 7, kind: output, shape index: {}]  }
   0x1   :  { %v894_v0 = vld [vmem:[%s1357_s1 + $0x8] sm:$0xff]  ;;  %v893_v1 = vld [vmem:[%s1357_s1] sm:$0xff] }
   0x2   :  { %135 = vmatpush.bf16.msra.mxu0 %v894_v0  ;;  %901 = vmatpush.bf16.msra.mxu3 %v894_v0 }
   0x3   :  { %12 = vsyncpa [#allocation3], 0  ;;  %v885_v2 = vld [vmem:[%s1356_s0] sm:$0xff]  ;;  %vm104_vm0 = vcmask 261120   ;;  %v886_v3 = vld [vmem:[%s1356_s0 + $0x8] sm:$0xff]  ;;  %vm238_vm1 = vcmask 523264  }
   0x4   :  { %v887_v4 = vld [vmem:[%s1356_s0 + $0x10] sm:$0xff]  ;;  %v888_v5 = vld [vmem:[%s1356_s0 + $0x18] sm:$0xff]  ;;  %v889_v6 = vld [vmem:[%s1356_s0 + $0x20] sm:$0xff]  ;;  %s788_s12 = sshll.u32 %s1363_s7, 4  ;;  %s789_s12 = int_to_ptr.hbm [resolvable:$true] %s788_s12 }
   0x5   :  { %v892_v7 = vld [vmem:[%s1356_s0 + $0x38] sm:$0xff]  ;;  %v890_v8 = vld [vmem:[%s1356_s0 + $0x28] sm:$0xff]  ;;  %v891_v10 = vld [vmem:[%s1356_s0 + $0x30] sm:$0xff] }
   0x6   :  { %136 = vmatpush.bf16.msra.mxu0 %v893_v1  ;;  %902 = vmatpush.bf16.msra.mxu3 %v893_v1  ;;  %v898_v9 = vld [vmem:[%s1359_s3 + $0x18] sm:$0xff]  ;;  %v897_v11 = vld [vmem:[%s1359_s3 + $0x10] sm:$0xff]  ;;  %v896_v12 = vld [vmem:[%s1359_s3 + $0x8] sm:$0xff] }
   0x7   :  { %267 = vmatpush.bf16.msra.mxu1 %v898_v9  ;;  %v895_v13 = vld [vmem:[%s1359_s3] sm:$0xff] }
   0x8   :  { %v1033_v15 = vld [vmem:[%s1358_s2] ss:$0 sm:$0xff] }
   0x9   :  { %837 = vmatmul.msk.bf16.vlgmr.msra.gmra.mxu0 %vm104_vm0, %v885_v2  ;;  %844 = vmatmul.msk.bf16.vlgmr.msra.gmra.mxu3 %vm104_vm0, %v892_v7  ;;  %v900_v2 = vld [vmem:[%s1361_s5 + $0x8] sm:$0xff] }
   0xa   :  { %903 = vmatpush.bf16.msrb.mxu3 %v898_v9  ;;  %386 = vmatpush.bf16.msra.mxu2 %v900_v2 }
   0xb   :  { %268 = vmatpush.bf16.msra.mxu1 %v897_v11 }
   0xe   :  { %904 = vmatpush.bf16.msrb.mxu3 %v897_v11 }
   0xf   :  { %269 = vmatpush.bf16.msra.mxu1 %v896_v12 }
  0x12   :  { %905 = vmatpush.bf16.msrb.mxu3 %v896_v12 }
  0x13   :  { %270 = vmatpush.bf16.msra.mxu1 %v895_v13 }
  0x16   :  { %906 = vmatpush.bf16.msrb.mxu3 %v895_v13 }
  0x19   :  { %838 = vmatmul.msk.bf16.gmra.mxu0 %vm104_vm0, %v886_v3 }
  0x1a   :  { %907 = vmatpush.bf16.msra.mxu3 %v900_v2  ;;  %v912_v2 = vld [vmem:[%s1362_s6] ss:$0 sm:$0xff]  ;;  %s939_s6 = smov [#allocation2]  }
  0x1b   :  { %s786_s1 = sshll.u32 %s939_s6, 4  ;;  %s787_s1 = int_to_ptr.vmem [resolvable:$true] %s786_s1 }
  0x29   :  { %839 = vmatmul.msk.bf16.gmra.mxu0 %vm104_vm0, %v887_v4 }
  0x39   :  { %840 = vmatmul.msk.bf16.gmra.mxu0 %vm104_vm0, %v888_v5  ;;  %v899_v5 = vld [vmem:[%s1361_s5] sm:$0xff] }
  0x3a   :  { %387 = vmatpush.bf16.msra.mxu2 %v899_v5  ;;  %908 = vmatpush.bf16.msra.mxu3 %v899_v5 }
  0x49   :  { %841 = vmatmul.msk.bf16.gmra.mxu0 %vm104_vm0, %v889_v6 }
  0x59   :  { %842 = vmatmul.msk.bf16.gmra.mxu0 %vm104_vm0, %v890_v8 }
  0x69   :  { %843 = vmatmul.msk.bf16.gmra.mxu0 %vm104_vm0, %v891_v10  ;;  %v911_v10 = vld [vmem:[%s1360_s4] ss:$0 sm:$0xff] }
  0x86   :  { %v138_v14 = vpop.f32.mrf.mxu0 }
  0x87   :  { %v139_v16 = vadd.f32 %v1033_v15, %v138_v14 }
  0x89   :  { %v178_v19 = vmax.f32 %v139_v16, 0.0 }
  0x8c   :  { %v173_v60 = vpop.f32.mrf.mxu3 }
  0x8d   :  { %v174_v3 = vadd.f32 %v1033_v15, %v173_v60 }
  0x8e   :  { %v140_v17 = vpop.f32.mrf.mxu0 }
  0x8f   :  { %v141_v18 = vadd.f32 %v1033_v15, %v140_v17  ;;  %v192_v6 = vmax.f32 %v174_v3, 0.0 }
  0x91   :  { %v179_v20 = vmax.f32 %v141_v18, 0.0 }
  0x93   :  { %v194_v21 = vpack.c.bf16 %v179_v20, %v178_v19 }
  0x94   :  { %v175_v1 = vpop.f32.mrf.mxu3 }
  0x95   :  { %861 = vmatmul.msk.bf16.vlgmr.msra.gmra.mxu1 %vm238_vm1, %v194_v21  ;;  %v176_v4 = vadd.f32 %v1033_v15, %v175_v1 }
  0x96   :  { %v143_v22 = vpop.f32.mrf.mxu0 }
  0x97   :  { %v144_v23 = vadd.f32 %v1033_v15, %v143_v22  ;;  %v193_v7 = vmax.f32 %v176_v4, 0.0 }
  0x99   :  { %v180_v26 = vmax.f32 %v144_v23, 0.0  ;;  %v201_v8 = vpack.c.bf16 %v193_v7, %v192_v6 }
  0x9e   :  { %v145_v24 = vpop.f32.mrf.mxu0 }
  0x9f   :  { %v146_v25 = vadd.f32 %v1033_v15, %v145_v24 }
  0xa1   :  { %v181_v27 = vmax.f32 %v146_v25, 0.0 }
  0xa3   :  { %v195_v28 = vpack.c.bf16 %v181_v27, %v180_v26 }
  0xa5   :  { %862 = vmatmul.msk.bf16.gmra.mxu1 %vm238_vm1, %v195_v28 }
  0xa6   :  { %v148_v29 = vpop.f32.mrf.mxu0 }
  0xa7   :  { %v149_v30 = vadd.f32 %v1033_v15, %v148_v29 }
  0xa9   :  { %v182_v33 = vmax.f32 %v149_v30, 0.0 }
  0xae   :  { %v150_v31 = vpop.f32.mrf.mxu0 }
  0xaf   :  { %v151_v32 = vadd.f32 %v1033_v15, %v150_v31 }
  0xb1   :  { %v183_v34 = vmax.f32 %v151_v32, 0.0 }
  0xb3   :  { %v196_v35 = vpack.c.bf16 %v183_v34, %v182_v33 }
  0xb5   :  { %863 = vmatmul.msk.bf16.gmra.mxu1 %vm238_vm1, %v196_v35 }
  0xb6   :  { %v153_v36 = vpop.f32.mrf.mxu0 }
  0xb7   :  { %v154_v37 = vadd.f32 %v1033_v15, %v153_v36 }
  0xb9   :  { %v184_v40 = vmax.f32 %v154_v37, 0.0 }
  0xbe   :  { %v155_v38 = vpop.f32.mrf.mxu0 }
  0xbf   :  { %v156_v39 = vadd.f32 %v1033_v15, %v155_v38 }
  0xc1   :  { %v185_v41 = vmax.f32 %v156_v39, 0.0 }
  0xc3   :  { %v197_v42 = vpack.c.bf16 %v185_v41, %v184_v40 }
  0xc5   :  { %864 = vmatmul.msk.bf16.gmra.mxu1 %vm238_vm1, %v197_v42 }
  0xc6   :  { %v158_v43 = vpop.f32.mrf.mxu0 }
  0xc7   :  { %v159_v44 = vadd.f32 %v1033_v15, %v158_v43 }
  0xc9   :  { %v186_v47 = vmax.f32 %v159_v44, 0.0 }
  0xce   :  { %v160_v45 = vpop.f32.mrf.mxu0 }
  0xcf   :  { %v161_v46 = vadd.f32 %v1033_v15, %v160_v45 }
  0xd1   :  { %v187_v48 = vmax.f32 %v161_v46, 0.0 }
  0xd3   :  { %v198_v49 = vpack.c.bf16 %v187_v48, %v186_v47 }
  0xd5   :  { %865 = vmatmul.msk.bf16.gmra.mxu1 %vm238_vm1, %v198_v49 }
  0xd6   :  { %v163_v50 = vpop.f32.mrf.mxu0 }
  0xd7   :  { %v164_v51 = vadd.f32 %v1033_v15, %v163_v50 }
  0xd9   :  { %v188_v54 = vmax.f32 %v164_v51, 0.0 }
  0xde   :  { %v165_v52 = vpop.f32.mrf.mxu0 }
  0xdf   :  { %v166_v53 = vadd.f32 %v1033_v15, %v165_v52 }
  0xe1   :  { %v189_v55 = vmax.f32 %v166_v53, 0.0 }
  0xe3   :  { %v199_v56 = vpack.c.bf16 %v189_v55, %v188_v54 }
  0xe5   :  { %866 = vmatmul.msk.bf16.gmra.mxu1 %vm238_vm1, %v199_v56 }
  0xe6   :  { %v168_v57 = vpop.f32.mrf.mxu0 }
  0xe7   :  { %v169_v58 = vadd.f32 %v1033_v15, %v168_v57 }
  0xe9   :  { %v190_v62 = vmax.f32 %v169_v58, 0.0 }
  0xee   :  { %v170_v59 = vpop.f32.mrf.mxu0 }
  0xef   :  { %v171_v61 = vadd.f32 %v1033_v15, %v170_v59 }
  0xf1   :  { %v191_v63 = vmax.f32 %v171_v61, 0.0 }
  0xf3   :  { %v200_v0 = vpack.c.bf16 %v191_v63, %v190_v62 }
  0xf5   :  { %867 = vmatmul.msk.bf16.vlgmr.msrb.gmra.mxu3 %vm238_vm1, %v200_v0 }
 0x105   :  { %868 = vmatmul.msk.bf16.gmra.mxu3 %vm238_vm1, %v201_v8 }
 0x112   :  { %v272_v9 = vpop.f32.mrf.mxu1 }
 0x113   :  { %v273_v11 = vadd.f32 %v911_v10, %v272_v9 }
 0x115   :  { %v312_v14 = vmax.f32 %v273_v11, 0.0 }
 0x11a   :  { %v274_v12 = vpop.f32.mrf.mxu1 }
 0x11b   :  { %v275_v13 = vadd.f32 %v911_v10, %v274_v12 }
 0x11d   :  { %v313_v15 = vmax.f32 %v275_v13, 0.0 }
 0x11f   :  { %v328_v16 = vpack.c.bf16 %v313_v15, %v312_v14 }
 0x121   :  { %877 = vmatmul.msk.bf16.vlgmr.msra.gmra.mxu2 %vm104_vm0, %v328_v16 }
 0x122   :  { %v277_v17 = vpop.f32.mrf.mxu1 }
 0x123   :  { %v278_v18 = vadd.f32 %v911_v10, %v277_v17 }
 0x125   :  { %v314_v21 = vmax.f32 %v278_v18, 0.0 }
 0x12a   :  { %v279_v19 = vpop.f32.mrf.mxu1 }
 0x12b   :  { %v280_v20 = vadd.f32 %v911_v10, %v279_v19 }
 0x12d   :  { %v315_v22 = vmax.f32 %v280_v20, 0.0 }
 0x12f   :  { %v329_v23 = vpack.c.bf16 %v315_v22, %v314_v21 }
 0x131   :  { %878 = vmatmul.msk.bf16.gmra.mxu2 %vm104_vm0, %v329_v23 }
 0x132   :  { %v282_v24 = vpop.f32.mrf.mxu1 }
 0x133   :  { %v283_v25 = vadd.f32 %v911_v10, %v282_v24 }
 0x135   :  { %v316_v28 = vmax.f32 %v283_v25, 0.0 }
 0x13a   :  { %v284_v26 = vpop.f32.mrf.mxu1 }
 0x13b   :  { %v285_v27 = vadd.f32 %v911_v10, %v284_v26 }
 0x13d   :  { %v317_v29 = vmax.f32 %v285_v27, 0.0 }
 0x13f   :  { %v330_v30 = vpack.c.bf16 %v317_v29, %v316_v28 }
 0x141   :  { %879 = vmatmul.msk.bf16.gmra.mxu2 %vm104_vm0, %v330_v30 }
 0x142   :  { %v287_v31 = vpop.f32.mrf.mxu1 }
 0x143   :  { %v288_v32 = vadd.f32 %v911_v10, %v287_v31  ;;  %v461_v31 = vlaneseq }
 0x145   :  { %v318_v35 = vmax.f32 %v288_v32, 0.0  ;;  %v1109_v32 = vand.u32 127, %v461_v31 }
 0x14a   :  { %v289_v33 = vpop.f32.mrf.mxu1 }
 0x14b   :  { %v290_v34 = vadd.f32 %v911_v10, %v289_v33 }
 0x14d   :  { %v319_v36 = vmax.f32 %v290_v34, 0.0 }
 0x14f   :  { %v331_v37 = vpack.c.bf16 %v319_v36, %v318_v35 }
 0x151   :  { %880 = vmatmul.msk.bf16.gmra.mxu2 %vm104_vm0, %v331_v37 }
 0x152   :  { %v292_v38 = vpop.f32.mrf.mxu1 }
 0x153   :  { %v293_v39 = vadd.f32 %v911_v10, %v292_v38 }
 0x155   :  { %v320_v42 = vmax.f32 %v293_v39, 0.0 }
 0x15a   :  { %v294_v40 = vpop.f32.mrf.mxu1 }
 0x15b   :  { %v295_v41 = vadd.f32 %v911_v10, %v294_v40 }
 0x15d   :  { %v321_v43 = vmax.f32 %v295_v41, 0.0 }
 0x15f   :  { %v332_v44 = vpack.c.bf16 %v321_v43, %v320_v42 }
 0x161   :  { %881 = vmatmul.msk.bf16.gmra.mxu2 %vm104_vm0, %v332_v44 }
 0x162   :  { %v297_v45 = vpop.f32.mrf.mxu1 }
 0x163   :  { %v298_v46 = vadd.f32 %v911_v10, %v297_v45 }
 0x165   :  { %v322_v49 = vmax.f32 %v298_v46, 0.0 }
 0x16a   :  { %v299_v47 = vpop.f32.mrf.mxu1 }
 0x16b   :  { %v300_v48 = vadd.f32 %v911_v10, %v299_v47 }
 0x16d   :  { %v323_v50 = vmax.f32 %v300_v48, 0.0 }
 0x16f   :  { %v333_v51 = vpack.c.bf16 %v323_v50, %v322_v49 }
 0x171   :  { %882 = vmatmul.msk.bf16.gmra.mxu2 %vm104_vm0, %v333_v51 }
 0x178   :  { %v302_v52 = vpop.f32.mrf.mxu3 }
 0x179   :  { %v303_v53 = vadd.f32 %v911_v10, %v302_v52 }
 0x17b   :  { %v324_v56 = vmax.f32 %v303_v53, 0.0 }
 0x180   :  { %v304_v54 = vpop.f32.mrf.mxu3 }
 0x181   :  { %v305_v55 = vadd.f32 %v911_v10, %v304_v54 }
 0x183   :  { %v325_v57 = vmax.f32 %v305_v55, 0.0 }
 0x185   :  { %v334_v58 = vpack.c.bf16 %v325_v57, %v324_v56 }
 0x187   :  { %883 = vmatmul.msk.bf16.gmra.mxu2 %vm104_vm0, %v334_v58 }
 0x188   :  { %v307_v59 = vpop.f32.mrf.mxu3 }
 0x189   :  { %v308_v60 = vadd.f32 %v911_v10, %v307_v59 }
 0x18b   :  { %v326_v63 = vmax.f32 %v308_v60, 0.0 }
 0x190   :  { %v309_v61 = vpop.f32.mrf.mxu3 }
 0x191   :  { %v310_v62 = vadd.f32 %v911_v10, %v309_v61 }
 0x193   :  { %v327_v0 = vmax.f32 %v310_v62, 0.0 }
 0x195   :  { %v335_v1 = vpack.c.bf16 %v327_v0, %v326_v63 }
 0x197   :  { %884 = vmatmul.msk.bf16.vlgmr.msra.gmra.mxu3 %vm104_vm0, %v335_v1 }
 0x1a4   :  { %v389_v3 = vpop.f32.mrf.mxu2 }
 0x1a5   :  { %v390_v4 = vadd.f32 %v912_v2, %v389_v3 }
 0x1a7   :  { %429 = vmax.xlane.f32.xlu0 %v390_v4 }
 0x1ac   :  { %v391_v5 = vpop.f32.mrf.mxu2 }
 0x1ad   :  { %v392_v6 = vadd.f32 %v912_v2, %v391_v5 }
 0x1af   :  { %431 = vmax.xlane.f32.xlu0 %v392_v6 }
 0x1b4   :  { %v394_v7 = vpop.f32.mrf.mxu2 }
 0x1b5   :  { %v395_v8 = vadd.f32 %v912_v2, %v394_v7 }
 0x1b7   :  { %433 = vmax.xlane.f32.xlu1 %v395_v8 }
 0x1bc   :  { %v396_v9 = vpop.f32.mrf.mxu2 }
 0x1bd   :  { %v397_v10 = vadd.f32 %v912_v2, %v396_v9 }
 0x1bf   :  { %435 = vmax.xlane.f32.xlu1 %v397_v10 }
 0x1c4   :  { %v399_v11 = vpop.f32.mrf.mxu2 }
 0x1c5   :  { %v1079_v12 = vadd.f32 %v912_v2, %v399_v11 }
 0x1c7   :  { %437 = vmax.xlane.f32.xlu2 %v1079_v12 }
 0x1cc   :  { %v401_v13 = vpop.f32.mrf.mxu2 }
 0x1cd   :  { %v1082_v14 = vadd.f32 %v912_v2, %v401_v13 }
 0x1cf   :  { %439 = vmax.xlane.f32.xlu2 %v1082_v14 }
 0x1d4   :  { %v404_v15 = vpop.f32.mrf.mxu2 }
 0x1d5   :  { %v1085_v16 = vadd.f32 %v912_v2, %v404_v15 }
 0x1d7   :  { %441 = vmax.xlane.f32.xlu0 %v1085_v16 }
 0x1dc   :  { %v406_v17 = vpop.f32.mrf.mxu2 }
 0x1dd   :  { %v1088_v18 = vadd.f32 %v912_v2, %v406_v17 }
 0x1df   :  { %443 = vmax.xlane.f32.xlu1 %v1088_v18 }
 0x1e4   :  { %v409_v19 = vpop.f32.mrf.mxu2 }
 0x1e5   :  { %v1091_v20 = vadd.f32 %v912_v2, %v409_v19 }
 0x1e7   :  { %445 = vmax.xlane.f32.xlu2 %v1091_v20 }
 0x1ec   :  { %v411_v21 = vpop.f32.mrf.mxu2 }
 0x1ed   :  { %v1094_v22 = vadd.f32 %v912_v2, %v411_v21 }
 0x1ef   :  { %447 = vmax.xlane.f32.xlu0 %v1094_v22 }
 0x1f4   :  { %v414_v23 = vpop.f32.mrf.mxu2 }
 0x1f5   :  { %v1097_v24 = vadd.f32 %v912_v2, %v414_v23 }
 0x1f7   :  { %449 = vmax.xlane.f32.xlu1 %v1097_v24 }
 0x1fc   :  { %v416_v25 = vpop.f32.mrf.mxu2 }
 0x1fd   :  { %v1100_v26 = vadd.f32 %v912_v2, %v416_v25 }
 0x1ff   :  { %451 = vmax.xlane.f32.xlu2 %v1100_v26 }
 0x20a   :  { %v419_v27 = vpop.f32.mrf.mxu2 }
 0x20b   :  { %v1103_v28 = vadd.f32 %v912_v2, %v419_v27 }
 0x20d   :  { %453 = vmax.xlane.f32.xlu0 %v1103_v28 }
 0x212   :  { %v421_v29 = vpop.f32.mrf.mxu2 }
 0x213   :  { %v1106_v30 = vadd.f32 %v912_v2, %v421_v29 }
 0x215   :  { %455 = vmax.xlane.f32.xlu1 %v1106_v30 }
 0x21a   :  { %v424_v33 = vpop.f32.mrf.mxu3  ;;  %v430_v34 = vpop.xlane.xlu0 %429 }
 0x21b   :  { %v1111_v35 = vadd.f32 %v912_v2, %v424_v33  ;;  %vm463_vm2 = vcmp.eq.f32.partialorder %v390_v4, %v430_v34 }
 0x21c   :  { %v1114_v36 = vsel %vm463_vm2, %v1109_v32, 128 }
 0x21d   :  { %457 = vmax.xlane.f32.xlu2 %v1111_v35  ;;  %v496_v37 = vshra.s32 %v1114_v36, 16 }
 0x21f   :  { %v1118_v38 = vcvt.s32.f32 %v496_v37 }
 0x221   :  { %499 = vmin.xlane.f32.xlu1 %v1118_v38 }
 0x222   :  { %v426_v39 = vpop.f32.mrf.mxu3  ;;  %v432_v40 = vpop.xlane.xlu0 %431 }
 0x223   :  { %v1121_v41 = vadd.f32 %v912_v2, %v426_v39  ;;  %vm464_vm3 = vcmp.eq.f32.partialorder %v392_v6, %v432_v40 }
 0x224   :  { %v1124_v42 = vsel %vm464_vm3, %v1109_v32, 128 }
 0x225   :  { %459 = vmax.xlane.f32.xlu0 %v1121_v41  ;;  %v510_v43 = vshra.s32 %v1124_v42, 16 }
 0x227   :  { %v1128_v44 = vcvt.s32.f32 %v510_v43 }
 0x229   :  { %513 = vmin.xlane.f32.xlu2 %v1128_v44 }
 0x22a   :  { %v434_v45 = vpop.xlane.xlu1 %433 }
 0x22b   :  { %vm465_vm4 = vcmp.eq.f32.partialorder %v395_v8, %v434_v45 }
 0x22c   :  { %v1132_v46 = vsel %vm465_vm4, %v1109_v32, 128 }
 0x22d   :  { %v524_v47 = vshra.s32 %v1132_v46, 16 }
 0x22f   :  { %v1135_v48 = vcvt.s32.f32 %v524_v47 }
 0x231   :  { %527 = vmin.xlane.f32.xlu0 %v1135_v48 }
 0x232   :  { %v436_v49 = vpop.xlane.xlu1 %435 }
 0x233   :  { %vm466_vm5 = vcmp.eq.f32.partialorder %v397_v10, %v436_v49 }
 0x234   :  { %v1139_v50 = vsel %vm466_vm5, %v1109_v32, 128 }
 0x235   :  { %v538_v51 = vshra.s32 %v1139_v50, 16 }
 0x237   :  { %v1142_v52 = vcvt.s32.f32 %v538_v51 }
 0x239   :  { %541 = vmin.xlane.f32.xlu1 %v1142_v52 }
 0x23a   :  { %v438_v53 = vpop.xlane.xlu2 %437 }
 0x23b   :  { %vm467_vm6 = vcmp.eq.f32.partialorder %v1079_v12, %v438_v53 }
 0x23c   :  { %v1147_v54 = vsel %vm467_vm6, %v1109_v32, 128 }
 0x23d   :  { %v552_v55 = vshra.s32 %v1147_v54, 16 }
 0x23f   :  { %v1150_v56 = vcvt.s32.f32 %v552_v55 }
 0x241   :  { %555 = vmin.xlane.f32.xlu2 %v1150_v56 }
 0x242   :  { %v440_v57 = vpop.xlane.xlu2 %439 }
 0x243   :  { %vm468_vm7 = vcmp.eq.f32.partialorder %v1082_v14, %v440_v57  ;;  %v537_v57 = vand.u32 65535, %v1139_v50 }
 0x244   :  { %v1155_v58 = vsel %vm468_vm7, %v1109_v32, 128 }
 0x245   :  { %v566_v59 = vshra.s32 %v1155_v58, 16  ;;  %v565_v50 = vand.u32 65535, %v1155_v58 }
 0x247   :  { %v1158_v60 = vcvt.s32.f32 %v566_v59 }
 0x249   :  { %569 = vmin.xlane.f32.xlu0 %v1158_v60 }
 0x24a   :  { %v442_v61 = vpop.xlane.xlu0 %441 }
 0x24b   :  { %vm469_vm8 = vcmp.eq.f32.partialorder %v1085_v16, %v442_v61 }
 0x24c   :  { %v1163_v62 = vsel %vm469_vm8, %v1109_v32, 128 }
 0x24d   :  { %v580_v63 = vshra.s32 %v1163_v62, 16 }
 0x24f   :  { %v1166_v0 = vcvt.s32.f32 %v580_v63 }
 0x251   :  { %583 = vmin.xlane.f32.xlu1 %v1166_v0 }
 0x252   :  { %v444_v1 = vpop.xlane.xlu1 %443 }
 0x253   :  { %vm470_vm9 = vcmp.eq.f32.partialorder %v1088_v18, %v444_v1 }
 0x254   :  { %v1171_v2 = vsel %vm470_vm9, %v1109_v32, 128 }
 0x255   :  { %v594_v3 = vshra.s32 %v1171_v2, 16  ;;  %v593_v58 = vand.u32 65535, %v1171_v2 }
 0x257   :  { %v1174_v4 = vcvt.s32.f32 %v594_v3 }
 0x259   :  { %597 = vmin.xlane.f32.xlu2 %v1174_v4 }
 0x25a   :  { %v446_v5 = vpop.xlane.xlu2 %445 }
 0x25b   :  { %vm471_vm10 = vcmp.eq.f32.partialorder %v1091_v20, %v446_v5  ;;  %v567_v5 = vcvt.s32.f32 %v565_v50 }
 0x25c   :  { %v1179_v6 = vsel %vm471_vm10, %v1109_v32, 128 }
 0x25d   :  { %v608_v7 = vshra.s32 %v1179_v6, 16 }
 0x25f   :  { %v1182_v8 = vcvt.s32.f32 %v608_v7 }
 0x261   :  { %611 = vmin.xlane.f32.xlu0 %v1182_v8 }
 0x262   :  { %v448_v9 = vpop.xlane.xlu0 %447 }
 0x263   :  { %vm472_vm11 = vcmp.eq.f32.partialorder %v1094_v22, %v448_v9 }
 0x264   :  { %v1187_v10 = vsel %vm472_vm11, %v1109_v32, 128 }
 0x265   :  { %v622_v11 = vshra.s32 %v1187_v10, 16  ;;  %v621_v2 = vand.u32 65535, %v1187_v10 }
 0x267   :  { %v1190_v12 = vcvt.s32.f32 %v622_v11 }
 0x269   :  { %625 = vmin.xlane.f32.xlu1 %v1190_v12 }
 0x26a   :  { %v450_v13 = vpop.xlane.xlu1 %449 }
 0x26b   :  { %vm473_vm12 = vcmp.eq.f32.partialorder %v1097_v24, %v450_v13  ;;  %v595_v13 = vcvt.s32.f32 %v593_v58 }
 0x26c   :  { %v1195_v14 = vsel %vm473_vm12, %v1109_v32, 128 }
 0x26d   :  { %v636_v15 = vshra.s32 %v1195_v14, 16 }
 0x26f   :  { %v1198_v16 = vcvt.s32.f32 %v636_v15 }
 0x271   :  { %639 = vmin.xlane.f32.xlu2 %v1198_v16 }
 0x272   :  { %v452_v17 = vpop.xlane.xlu2 %451 }
 0x273   :  { %vm474_vm13 = vcmp.eq.f32.partialorder %v1100_v26, %v452_v17 }
 0x274   :  { %v1203_v18 = vsel %vm474_vm13, %v1109_v32, 128 }
 0x275   :  { %v650_v19 = vshra.s32 %v1203_v18, 16  ;;  %v649_v10 = vand.u32 65535, %v1203_v18 }
 0x277   :  { %v1206_v20 = vcvt.s32.f32 %v650_v19 }
 0x279   :  { %653 = vmin.xlane.f32.xlu0 %v1206_v20 }
 0x280   :  { %v454_v21 = vpop.xlane.xlu0 %453 }
 0x281   :  { %vm475_vm14 = vcmp.eq.f32.partialorder %v1103_v28, %v454_v21  ;;  %v495_v28 = vand.u32 65535, %v1114_v36  ;;  %v509_v36 = vand.u32 65535, %v1124_v42  ;;  %v523_v42 = vand.u32 65535, %v1132_v46 }
 0x282   :  { %v1211_v22 = vsel %vm475_vm14, %v1109_v32, 128  ;;  %v551_v46 = vand.u32 65535, %v1147_v54  ;;  %v579_v54 = vand.u32 65535, %v1163_v62  ;;  %v607_v62 = vand.u32 65535, %v1179_v6 }
 0x283   :  { %v664_v23 = vshra.s32 %v1211_v22, 16  ;;  %v497_v37 = vcvt.s32.f32 %v495_v28  ;;  %v511_v49 = vcvt.s32.f32 %v509_v36  ;;  %v525_v53 = vcvt.s32.f32 %v523_v42 }
 0x284   :  { %v553_v1 = vcvt.s32.f32 %v551_v46  ;;  %v581_v9 = vcvt.s32.f32 %v579_v54  ;;  %v609_v17 = vcvt.s32.f32 %v607_v62  ;;  %v623_v21 = vcvt.s32.f32 %v621_v2 }
 0x285   :  { %v1214_v24 = vcvt.s32.f32 %v664_v23  ;;  %v635_v6 = vand.u32 65535, %v1195_v14  ;;  %v651_v28 = vcvt.s32.f32 %v649_v10  ;;  %v663_v14 = vand.u32 65535, %v1211_v22 }
 0x286   :  { %v728_v62 = vadd.s32 4294967272, %v1109_v32 }
 0x287   :  { %667 = vmin.xlane.f32.xlu1 %v1214_v24 }
 0x288   :  { %v456_v25 = vpop.xlane.xlu1 %455 }
 0x289   :  { %vm476_vm15 = vcmp.eq.f32.partialorder %v1106_v30, %v456_v25  ;;  %v637_v25 = vcvt.s32.f32 %v635_v6 }
 0x28a   :  { %v1219_v26 = vsel %vm476_vm15, %v1109_v32, 128 }
 0x28b   :  { %v678_v27 = vshra.s32 %v1219_v26, 16  ;;  %v677_v18 = vand.u32 65535, %v1219_v26 }
 0x28d   :  { %v1222_v29 = vcvt.s32.f32 %v678_v27 }
 0x28f   :  { %681 = vmin.xlane.f32.xlu2 %v1222_v29 }
 0x290   :  { %v458_v31 = vpop.xlane.xlu2 %457 }
 0x291   :  { %vm477_vm0 = vcmp.eq.f32.partialorder %v1111_v35, %v458_v31 }
 0x292   :  { %v1228_v33 = vsel %vm477_vm0, %v1109_v32, 128 }
 0x293   :  { %v692_v34 = vshra.s32 %v1228_v33, 16  ;;  %v691_v22 = vand.u32 65535, %v1228_v33 }
 0x294   :  { %v1231_v30 = vpop.xlane.xlu1 %499 }
 0x295   :  { %v1233_v39 = vcvt.s32.f32 %v692_v34  ;;  %vm501_vm1 = vcmp.eq.f32.partialorder %v1118_v38, %v1231_v30  ;;  %v665_v34 = vcvt.s32.f32 %v663_v14  ;;  %v506_v26 = vcvt.f32.s32 %v1231_v30 }
 0x296   :  { %v502_v40 = vsel %vm501_vm1, %v497_v37, inf }
 0x297   :  { %695 = vmin.xlane.f32.xlu0 %v1233_v39  ;;  %503 = vmin.xlane.f32.xlu2 %v502_v40  ;;  %v679_v40 = vcvt.s32.f32 %v677_v18  ;;  %v507_v42 = vshll.u32 %v506_v26, 16 }
 0x298   :  { %v460_v35 = vpop.xlane.xlu0 %459 }
 0x299   :  { %vm478_vm2 = vcmp.eq.f32.partialorder %v1121_v41, %v460_v35  ;;  %v693_v35 = vcvt.s32.f32 %v691_v22 }
 0x29a   :  { %v1241_v43 = vsel %vm478_vm2, %v1109_v32, 128  ;;  %vm722_vm2 = vcmask 130112  }
 0x29b   :  { %v706_v45 = vshra.s32 %v1241_v43, 16 }
 0x29c   :  { %v1244_v47 = vpop.xlane.xlu2 %513 }
 0x29d   :  { %vm515_vm3 = vcmp.eq.f32.partialorder %v1128_v44, %v1244_v47  ;;  %v1248_v38 = vcvt.s32.f32 %v706_v45  ;;  %v539_v44 = vcvt.s32.f32 %v537_v57 }
 0x29e   :  { %v516_v51 = vsel %vm515_vm3, %v511_v49, inf  ;;  %v705_v49 = vand.u32 65535, %v1241_v43  ;;  %vm726_vm3 = vcmask 195712  }
 0x29f   :  { %517 = vmin.xlane.f32.xlu0 %v516_v51  ;;  %709 = vmin.xlane.f32.xlu1 %v1248_v38  ;;  %v520_v51 = vcvt.f32.s32 %v1244_v47 }
 0x2a0   :  { %v707_v57 = vcvt.s32.f32 %v705_v49 }
 0x2a4   :  { %v1252_v41 = vpop.xlane.xlu0 %527 }
 0x2a5   :  { %vm529_vm4 = vcmp.eq.f32.partialorder %v1135_v48, %v1252_v41  ;;  %v534_v43 = vcvt.f32.s32 %v1252_v41 }
 0x2a6   :  { %v530_v55 = vsel %vm529_vm4, %v525_v53, inf  ;;  %v521_v53 = vshll.u32 %v520_v51, 16  ;;  %vm730_vm4 = vcmask 261312  }
 0x2a7   :  { %531 = vmin.xlane.f32.xlu1 %v530_v55 }
 0x2ac   :  { %v1257_v59 = vpop.xlane.xlu1 %541 }
 0x2ad   :  { %vm543_vm5 = vcmp.eq.f32.partialorder %v1142_v52, %v1257_v59 }
 0x2ae   :  { %v544_v61 = vsel %vm543_vm5, %v539_v44, inf  ;;  %vm734_vm5 = vcmask 326912  }
 0x2af   :  { %545 = vmin.xlane.f32.xlu2 %v544_v61  ;;  %v720_v61 = vadd.s32 4294967288, %v1109_v32 }
 0x2b4   :  { %v1262_v63 = vpop.xlane.xlu2 %555 }
 0x2b5   :  { %vm557_vm6 = vcmp.eq.f32.partialorder %v1150_v56, %v1262_v63 }
 0x2b6   :  { %v558_v48 = vsel %vm557_vm6, %v553_v1, inf  ;;  %vm738_vm6 = vcmask 392512  }
 0x2b7   :  { %559 = vmin.xlane.f32.xlu0 %v558_v48 }
 0x2bc   :  { %v1267_v3 = vpop.xlane.xlu0 %569 }
 0x2bd   :  { %vm571_vm7 = vcmp.eq.f32.partialorder %v1158_v60, %v1267_v3 }
 0x2be   :  { %v572_v52 = vsel %vm571_vm7, %v567_v5, inf  ;;  %v535_v5 = vshll.u32 %v534_v43, 16  ;;  %vm742_vm7 = vcmask 458112   ;;  %v748_v43 = vadd.s32 4294967232, %v1109_v32 }
 0x2bf   :  { %573 = vmin.xlane.f32.xlu1 %v572_v52  ;;  %v724_v52 = vadd.s32 4294967280, %v1109_v32 }
 0x2c4   :  { %v1272_v7 = vpop.xlane.xlu1 %583 }
 0x2c5   :  { %vm585_vm8 = vcmp.eq.f32.partialorder %v1166_v0, %v1272_v7 }
 0x2c6   :  { %v586_v56 = vsel %vm585_vm8, %v581_v9, inf  ;;  %vm746_vm8 = vcmask 523712  }
 0x2c7   :  { %587 = vmin.xlane.f32.xlu2 %v586_v56  ;;  %v548_v56 = vcvt.f32.s32 %v1257_v59  ;;  %v576_v59 = vcvt.f32.s32 %v1267_v3 }
 0x2cc   :  { %v1277_v11 = vpop.xlane.xlu2 %597 }
 0x2cd   :  { %vm599_vm9 = vcmp.eq.f32.partialorder %v1174_v4, %v1277_v11  ;;  %v604_v3 = vcvt.f32.s32 %v1277_v11 }
 0x2ce   :  { %v600_v60 = vsel %vm599_vm9, %v595_v13, inf  ;;  %vm750_vm9 = vcmask 589312  }
 0x2cf   :  { %601 = vmin.xlane.f32.xlu0 %v600_v60  ;;  %v549_v60 = vshll.u32 %v548_v56, 16 }
 0x2d4   :  { %v1282_v15 = vpop.xlane.xlu0 %611 }
 0x2d5   :  { %vm613_vm10 = vcmp.eq.f32.partialorder %v1182_v8, %v1282_v15 }
 0x2d6   :  { %v614_v0 = vsel %vm613_vm10, %v609_v17, inf  ;;  %vm754_vm10 = vcmask 654912  }
 0x2d7   :  { %615 = vmin.xlane.f32.xlu1 %v614_v0  ;;  %v562_v0 = vcvt.f32.s32 %v1262_v63  ;;  %v590_v63 = vcvt.f32.s32 %v1272_v7  ;;  %v618_v7 = vcvt.f32.s32 %v1282_v15 }
 0x2d9   :  { %v563_v6 = vshll.u32 %v562_v0, 16 }
 0x2dc   :  { %v1287_v19 = vpop.xlane.xlu1 %625 }
 0x2dd   :  { %vm627_vm11 = vcmp.eq.f32.partialorder %v1190_v12, %v1287_v19  ;;  %v632_v11 = vcvt.f32.s32 %v1287_v19 }
 0x2de   :  { %v628_v4 = vsel %vm627_vm11, %v623_v21, inf  ;;  %vm758_vm11 = vcmask 720512  }
 0x2df   :  { %629 = vmin.xlane.f32.xlu2 %v628_v4 }
 0x2e4   :  { %v1292_v23 = vpop.xlane.xlu2 %639 }
 0x2e5   :  { %vm641_vm12 = vcmp.eq.f32.partialorder %v1198_v16, %v1292_v23  ;;  %v646_v15 = vcvt.f32.s32 %v1292_v23 }
 0x2e6   :  { %v642_v8 = vsel %vm641_vm12, %v637_v25, inf  ;;  %v732_v25 = vadd.s32 4294967264, %v1109_v32  ;;  %vm762_vm12 = vcmask 786112  }
 0x2e7   :  { %643 = vmin.xlane.f32.xlu0 %v642_v8 }
 0x2ec   :  { %v1297_v27 = vpop.xlane.xlu0 %653 }
 0x2ed   :  { %vm655_vm13 = vcmp.eq.f32.partialorder %v1206_v20, %v1297_v27  ;;  %v660_v19 = vcvt.f32.s32 %v1297_v27 }
 0x2ee   :  { %v656_v12 = vsel %vm655_vm13, %v651_v28, inf  ;;  %vm766_vm13 = vcmask 851712  }
 0x2ef   :  { %657 = vmin.xlane.f32.xlu1 %v656_v12 }
 0x2fa   :  { %v1302_v31 = vpop.xlane.xlu1 %667 }
 0x2fb   :  { %vm669_vm14 = vcmp.eq.f32.partialorder %v1214_v24, %v1302_v31 }
 0x2fc   :  { %v670_v16 = vsel %vm669_vm14, %v665_v34, inf  ;;  %v577_v34 = vshll.u32 %v576_v59, 16  ;;  %v674_v59 = vcvt.f32.s32 %v1302_v31  ;;  %vm770_vm14 = vcmask 917312  }
 0x2fd   :  { %671 = vmin.xlane.f32.xlu2 %v670_v16  ;;  %v736_v16 = vadd.s32 4294967256, %v1109_v32 }
 0x302   :  { %v1307_v37 = vpop.xlane.xlu2 %681 }
 0x303   :  { %vm683_vm15 = vcmp.eq.f32.partialorder %v1222_v29, %v1307_v37  ;;  %v688_v27 = vcvt.f32.s32 %v1307_v37 }
 0x304   :  { %v684_v20 = vsel %vm683_vm15, %v679_v40, inf  ;;  %vm774_vm15 = vcmask 982912  }
 0x305   :  { %685 = vmin.xlane.f32.xlu0 %v684_v20 }
 0x30a   :  { %v1312_v36 = vpop.xlane.xlu0 %695  ;;  %v504_v24 = vpop.xlane.xlu2 %503 }
 0x30b   :  { %vm697_vm0 = vcmp.eq.f32.partialorder %v1233_v39, %v1312_v36  ;;  %v505_v29 = vcvt.f32.s32 %v504_v24  ;;  %v591_v24 = vshll.u32 %v590_v63, 16  ;;  %v702_v31 = vcvt.f32.s32 %v1312_v36 }
 0x30c   :  { %v698_v45 = vsel %vm697_vm0, %v693_v35, inf  ;;  %vm778_vm0 = vcmask 1048512  }
 0x30d   :  { %699 = vmin.xlane.f32.xlu1 %v698_v45  ;;  %v508_v44 = vadd.s32 %v507_v42, %v505_v29  ;;  %v740_v45 = vadd.s32 4294967248, %v1109_v32 }
 0x30f   :  { %v719_v47 = vperm.slane %v508_v44, %v1109_v32 }
 0x312   :  { %v1319_v55 = vpop.xlane.xlu1 %709  ;;  %v518_v33 = vpop.xlane.xlu0 %517 }
 0x313   :  { %v519_v39 = vcvt.f32.s32 %v518_v33  ;;  %vm711_vm1 = vcmp.eq.f32.partialorder %v1248_v38, %v1319_v55  ;;  %v744_v33 = vadd.s32 4294967240, %v1109_v32  ;;  %v716_v37 = vcvt.f32.s32 %v1319_v55 }
 0x314   :  { %v712_v30 = vsel %vm711_vm1, %v707_v57, inf }
 0x315   :  { %v522_v46 = vadd.s32 %v521_v53, %v519_v39  ;;  %713 = vmin.xlane.f32.xlu2 %v712_v30  ;;  %v605_v53 = vshll.u32 %v604_v3, 16  ;;  %v703_v3 = vshll.u32 %v702_v31, 16 }
 0x317   :  { %v721_v1 = vperm.slane %v522_v46, %v720_v61  ;;  %v619_v46 = vshll.u32 %v618_v7, 16  ;;  %v776_v7 = vadd.s32 4294967176, %v1109_v32 }
 0x319   :  { %v723_v48 = vsel %vm722_vm2, %v721_v1, %v719_v47 }
 0x31a   :  { %v532_v50 = vpop.xlane.xlu1 %531 }
 0x31b   :  { %v533_v54 = vcvt.f32.s32 %v532_v50 }
 0x31d   :  { %v536_v9 = vadd.s32 %v535_v5, %v533_v54  ;;  %v752_v54 = vadd.s32 4294967224, %v1109_v32 }
 0x31f   :  { %v725_v38 = vperm.slane %v536_v9, %v724_v52  ;;  %v633_v52 = vshll.u32 %v632_v11, 16 }
 0x321   :  { %v727_v58 = vsel %vm726_vm3, %v725_v38, %v723_v48 }
 0x322   :  { %v546_v13 = vpop.xlane.xlu2 %545 }
 0x323   :  { %v547_v41 = vcvt.f32.s32 %v546_v13 }
 0x325   :  { %v550_v17 = vadd.s32 %v549_v60, %v547_v41  ;;  %v647_v60 = vshll.u32 %v646_v15, 16 }
 0x327   :  { %v729_v2 = vperm.slane %v550_v17, %v728_v62  ;;  %v756_v62 = vadd.s32 4294967216, %v1109_v32 }
 0x329   :  { %v731_v21 = vsel %vm730_vm4, %v729_v2, %v727_v58 }
 0x32a   :  { %v560_v4 = vpop.xlane.xlu0 %559 }
 0x32b   :  { %v561_v8 = vcvt.f32.s32 %v560_v4  ;;  %v661_v4 = vshll.u32 %v660_v19, 16 }
 0x32d   :  { %v564_v10 = vadd.s32 %v563_v6, %v561_v8  ;;  %v760_v6 = vadd.s32 4294967208, %v1109_v32 }
 0x32f   :  { %v733_v28 = vperm.slane %v564_v10, %v732_v25 }
 0x331   :  { %v735_v12 = vsel %vm734_vm5, %v733_v28, %v731_v21 }
 0x332   :  { %v574_v14 = vpop.xlane.xlu1 %573 }
 0x333   :  { %v575_v18 = vcvt.f32.s32 %v574_v14  ;;  %v764_v14 = vadd.s32 4294967200, %v1109_v32 }
 0x335   :  { %v578_v40 = vadd.s32 %v577_v34, %v575_v18 }
 0x337   :  { %v737_v20 = vperm.slane %v578_v40, %v736_v16 }
 0x339   :  { %v739_v22 = vsel %vm738_vm6, %v737_v20, %v735_v12  ;;  %v675_v12 = vshll.u32 %v674_v59, 16  ;;  %v689_v20 = vshll.u32 %v688_v27, 16 }
 0x33a   :  { %v588_v35 = vpop.xlane.xlu2 %587 }
 0x33b   :  { %v589_v26 = vcvt.f32.s32 %v588_v35 }
 0x33d   :  { %v592_v49 = vadd.s32 %v591_v24, %v589_v26 }
 0x33f   :  { %v741_v51 = vperm.slane %v592_v49, %v740_v45 }
 0x341   :  { %v743_v29 = vsel %vm742_vm7, %v741_v51, %v739_v22  ;;  %v768_v22 = vadd.s32 4294967192, %v1109_v32  ;;  %v772_v51 = vadd.s32 4294967184, %v1109_v32 }
 0x342   :  { %v602_v42 = vpop.xlane.xlu0 %601 }
 0x343   :  { %v603_v57 = vcvt.f32.s32 %v602_v42 }
 0x345   :  { %v606_v44 = vadd.s32 %v605_v53, %v603_v57 }
 0x347   :  { %v745_v61 = vperm.slane %v606_v44, %v744_v33  ;;  %v717_v44 = vshll.u32 %v716_v37, 16 }
 0x349   :  { %v747_v39 = vsel %vm746_vm8, %v745_v61, %v743_v29 }
 0x34a   :  { %v616_v30 = vpop.xlane.xlu1 %615 }
 0x34b   :  { %v617_v47 = vcvt.f32.s32 %v616_v30 }
 0x34d   :  { %v620_v1 = vadd.s32 %v619_v46, %v617_v47 }
 0x34f   :  { %v749_v48 = vperm.slane %v620_v1, %v748_v43 }
 0x351   :  { %v751_v50 = vsel %vm750_vm9, %v749_v48, %v747_v39 }
 0x352   :  { %v630_v5 = vpop.xlane.xlu2 %629 }
 0x353   :  { %v631_v9 = vcvt.f32.s32 %v630_v5 }
 0x355   :  { %v634_v56 = vadd.s32 %v633_v52, %v631_v9 }
 0x357   :  { %v753_v38 = vperm.slane %v634_v56, %v752_v54 }
 0x359   :  { %v755_v58 = vsel %vm754_vm10, %v753_v38, %v751_v50 }
 0x35a   :  { %v644_v13 = vpop.xlane.xlu0 %643 }
 0x35b   :  { %v645_v41 = vcvt.f32.s32 %v644_v13 }
 0x35d   :  { %v648_v17 = vadd.s32 %v647_v60, %v645_v41 }
 0x35f   :  { %v757_v0 = vperm.slane %v648_v17, %v756_v62 }
 0x361   :  { %v759_v2 = vsel %vm758_vm11, %v757_v0, %v755_v58 }
 0x362   :  { %v658_v21 = vpop.xlane.xlu1 %657 }
 0x363   :  { %v659_v25 = vcvt.f32.s32 %v658_v21 }
 0x365   :  { %v662_v8 = vadd.s32 %v661_v4, %v659_v25 }
 0x367   :  { %v761_v23 = vperm.slane %v662_v8, %v760_v6 }
 0x369   :  { %v763_v10 = vsel %vm762_vm12, %v761_v23, %v759_v2 }
 0x370   :  { %v672_v28 = vpop.xlane.xlu2 %671 }
 0x371   :  { %v673_v34 = vcvt.f32.s32 %v672_v28 }
 0x373   :  { %v676_v16 = vadd.s32 %v675_v12, %v673_v34 }
 0x375   :  { %v765_v18 = vperm.slane %v676_v16, %v764_v14 }
 0x377   :  { %v767_v40 = vsel %vm766_vm13, %v765_v18, %v763_v10 }
 0x378   :  { %v686_v63 = vpop.xlane.xlu0 %685 }
 0x379   :  { %v687_v35 = vcvt.f32.s32 %v686_v63 }
 0x37b   :  { %v690_v24 = vadd.s32 %v689_v20, %v687_v35 }
 0x37d   :  { %v769_v45 = vperm.slane %v690_v24, %v768_v22 }
 0x37f   :  { %v771_v26 = vsel %vm770_vm14, %v769_v45, %v767_v40 }
 0x380   :  { %v700_v49 = vpop.xlane.xlu1 %699 }
 0x381   :  { %v701_v29 = vcvt.f32.s32 %v700_v49 }
 0x383   :  { %v704_v42 = vadd.s32 %v703_v3, %v701_v29 }
 0x385   :  { %v773_v53 = vperm.slane %v704_v42, %v772_v51 }
 0x387   :  { %v775_v33 = vsel %vm774_vm15, %v773_v53, %v771_v26 }
 0x388   :  { %v714_v57 = vpop.xlane.xlu2 %713 }
 0x389   :  { %v715_v61 = vcvt.f32.s32 %v714_v57 }
 0x38b   :  { %v718_v39 = vadd.s32 %v717_v44, %v715_v61 }
 0x38d   :  { %v777_v36 = vperm.slane %v718_v39, %v776_v7 }
 0x38f   :  { %v779_v30 = vsel %vm778_vm0, %v777_v36, %v775_v33 }
 0x390   :  { %780 = vst [vmem:[#allocation2] sm:$0x1] %v779_v30 }
 0x391   :  { %791 = dma.vmem_to_hbm [thread:$0]  %s787_s1, 16, %s789_s12, [#allocation3]  }
 0x392   :  { %937 = dma.done.wait [#allocation3], 16  }
 0x393   :  { %938 = vsyncadd [#allocation3], 4294967280 }
 0x394   :  { %796 = vsyncpa [#allocation3], 1 }

</bundles_post_ra>
